<compile_context>
chip_gen: v7x
topology: tpu7x:2x2x1
jax: 0.10.0
libtpu: 0.0.40
codegen_flags: <defaults>
</compile_context>

<pallas_src>
import functools
import math

import jax
import jax.numpy as jnp
from jax.experimental import pallas as pl
from jax.experimental.pallas import tpu as pltpu

# Scoped VMEM budget.  64 MiB is legal on every generation (v7x physical VMEM
# is 64 MiB; v5e/v6e have 128 MiB and could go higher).  Actual per-step usage
# of the kernels below is far smaller; this is headroom for double-buffering.
_VMEM_LIMIT_BYTES = 64 * 1024 * 1024

# Large-but-finite negative for masked logits and the running-max init
# (finite so exp(m_prev - m_new) never sees inf - inf).
_MASK_VALUE = -0.7 * float(jnp.finfo(jnp.float32).max)


def _round_up(x, m):
    return ((x + m - 1) // m) * m


# ---------------------------------------------------------------------------
# Generic tiled linear:  y = x @ w   (w already transposed to (K, N))
# ---------------------------------------------------------------------------
def _matmul_kernel(x_ref, w_ref, o_ref, acc_ref):
    @pl.when(pl.program_id(2) == 0)
    def _():
        acc_ref[...] = jnp.zeros_like(acc_ref)

    # Operands go to the MXU in their native dtype (pass bf16 inputs for 2x
    # MXU throughput / half the DMA bytes); accumulation is always f32.
    acc_ref[...] += jnp.dot(x_ref[...], w_ref[...],
                            preferred_element_type=jnp.float32)

    @pl.when(pl.program_id(2) == pl.num_programs(2) - 1)
    def _():
        o_ref[...] = acc_ref[...].astype(o_ref.dtype)


def _tile_and_pad(dim, preferred):
    """Return (tile, padded_dim).  Small dims become a single full block;
    large dims are tiled at `preferred` (a multiple of 128) and padded up so
    the tile always divides the padded dim (never a full-dim fallback block)."""
    if dim <= preferred:
        return dim, dim
    return preferred, _round_up(dim, preferred)


def _linear(x, w, *, tm=512, tn=512, tk=1024):
    """x: (M, K), w: (K, N) -> (M, N) with f32 MXU accumulation."""
    M, K = x.shape
    K2, N = w.shape
    assert K == K2
    tm, Mp = _tile_and_pad(M, tm)
    tn, Np = _tile_and_pad(N, tn)
    tk, Kp = _tile_and_pad(K, tk)
    if (Mp, Kp) != (M, K):
        x = jnp.pad(x, ((0, Mp - M), (0, Kp - K)))
    if (Kp, Np) != (K, N):
        w = jnp.pad(w, ((0, Kp - K), (0, Np - N)))
    grid = (Mp // tm, Np // tn, Kp // tk)

    nbytes = x.dtype.itemsize
    cost = pl.CostEstimate(
        flops=2 * Mp * Np * Kp, transcendentals=0,
        bytes_accessed=(Mp * Kp + Kp * Np + Mp * Np) * nbytes)

    out = pl.pallas_call(
        _matmul_kernel,
        out_shape=jax.ShapeDtypeStruct((Mp, Np), x.dtype),
        grid_spec=pltpu.PrefetchScalarGridSpec(
            num_scalar_prefetch=0,
            grid=grid,
            in_specs=[
                pl.BlockSpec((tm, tk), lambda i, j, k: (i, k)),
                pl.BlockSpec((tk, tn), lambda i, j, k: (k, j)),
            ],
            out_specs=pl.BlockSpec((tm, tn), lambda i, j, k: (i, j)),
            scratch_shapes=[pltpu.VMEM((tm, tn), jnp.float32)],
        ),
        compiler_params=pltpu.CompilerParams(
            dimension_semantics=("parallel", "parallel", "arbitrary"),
            vmem_limit_bytes=_VMEM_LIMIT_BYTES),
        cost_estimate=cost,
    )(x, w)
    if (Mp, Np) != (M, N):
        out = out[:M, :N]
    return out


# ---------------------------------------------------------------------------
# Flash-style attention core (RoPE + QK^T + mask + online fp32 softmax + PV)
# ---------------------------------------------------------------------------
def _flash_attn_kernel(*refs, scale, groups, causal, has_mask):
    if has_mask:
        (q_ref, k_ref, v_ref, cq_ref, sq_ref, ck_ref, sk_ref, mask_ref,
         o_ref, m_ref, l_ref, acc_ref) = refs
    else:
        (q_ref, k_ref, v_ref, cq_ref, sq_ref, ck_ref, sk_ref,
         o_ref, m_ref, l_ref, acc_ref) = refs
        mask_ref = None

    qi = pl.program_id(2)
    ki = pl.program_id(3)
    n_kv = pl.num_programs(3)

    _, G, tq, D = q_ref.shape
    tkv = k_ref.shape[2]

    @pl.when(ki == 0)
    def _():
        m_ref[...] = jnp.full_like(m_ref, _MASK_VALUE)
        l_ref[...] = jnp.zeros_like(l_ref)
        acc_ref[...] = jnp.zeros_like(acc_ref)

    def rope(t, cos, sin):
        # rotate_half(t) = concat(-t[..., D/2:], t[..., :D/2])
        half = t.shape[-1] // 2
        rot = jnp.concatenate([-t[:, half:], t[:, :half]], axis=-1)
        return t * cos + rot * sin

    # Q tile for the whole GQA group, flattened to (G*tq, D).
    q = q_ref[0].reshape(G * tq, D)
    q = rope(q, jnp.tile(cq_ref[0], (G, 1)), jnp.tile(sq_ref[0], (G, 1)))

    # K/V tile for this KV head, RoPE'd once per grid step (shared by the
    # whole group -> repeat_kv is never materialized).
    k = rope(k_ref[0, 0], ck_ref[0], sk_ref[0])
    v = v_ref[0, 0]

    # scores: (G*tq, tkv), MXU with f32 accumulation.
    s = jax.lax.dot_general(q, k, (((1,), (1,)), ((), ())),
                            preferred_element_type=jnp.float32) * scale

    bias = None
    if has_mask:
        bias = mask_ref[0, 0].astype(jnp.float32)
    if causal:
        row = qi * tq + jax.lax.broadcasted_iota(jnp.int32, (tq, tkv), 0)
        col = ki * tkv + jax.lax.broadcasted_iota(jnp.int32, (tq, tkv), 1)
        cb = jnp.where(col <= row, 0.0, _MASK_VALUE)
        bias = cb if bias is None else bias + cb
    if bias is not None:
        s = s + jnp.tile(bias, (G, 1))

    # Online softmax (fp32 running max / sum / accumulator in VMEM scratch).
    m_prev = m_ref[...]
    m_new = jnp.maximum(m_prev, jnp.max(s, axis=-1, keepdims=True))
    alpha = jnp.exp(m_prev - m_new)
    p = jnp.exp(s - m_new)
    l_ref[...] = alpha * l_ref[...] + jnp.sum(p, axis=-1, keepdims=True)
    acc_ref[...] = alpha * acc_ref[...] + jnp.dot(
        p.astype(v.dtype), v, preferred_element_type=jnp.float32)
    m_ref[...] = m_new

    @pl.when(ki == n_kv - 1)
    def _():
        # TODO(synk): on hardware pl.reciprocal(l_ref[...], approx=True) would
        # push this divide onto the (idle) EUP; plain divide kept for
        # portability/interpret-mode safety.
        out = acc_ref[...] / l_ref[...]
        o_ref[0] = out.reshape(G, tq, D).astype(o_ref.dtype)


def _pick_seq_tile(S, preferred, multiple):
    """Largest divisor of S that is a multiple of `multiple` and <= preferred;
    falls back to the full S (single block) when no such divisor exists."""
    if S <= preferred:
        return S
    t = (preferred // multiple) * multiple
    while t >= multiple:
        if S % t == 0:
            return t
        t -= multiple
    return S


def _flash_attention(q, k, v, cos_pos, sin_pos, attention_mask, *, causal):
    """q: (B, NH, S, D); k, v: (B, KVH, S, D); cos/sin: (B, S, D);
    attention_mask: None or additive (B, 1, S, S).  Returns (B, NH, S, D)."""
    B, NH, S, D = q.shape
    KVH = k.shape[1]
    groups = NH // KVH
    scale = 1.0 / math.sqrt(D)
    has_mask = attention_mask is not None

    # Q tile sized so the group-batched row count (groups*tq) stays moderate;
    # KV tile prefers 512 and keeps the (optional) mask lane dim 128-aligned.
    tq = _pick_seq_tile(S, 256 if groups <= 2 else 128, 8)
    tkv = _pick_seq_tile(S, 512, 128)
    n_q, n_kv = S // tq, S // tkv

    in_specs = [
        pl.BlockSpec((1, groups, tq, D), lambda b, g, i, j: (b, g, i, 0)),  # q
        pl.BlockSpec((1, 1, tkv, D), lambda b, g, i, j: (b, g, j, 0)),      # k
        pl.BlockSpec((1, 1, tkv, D), lambda b, g, i, j: (b, g, j, 0)),      # v
        pl.BlockSpec((1, tq, D), lambda b, g, i, j: (b, i, 0)),             # cos(q rows)
        pl.BlockSpec((1, tq, D), lambda b, g, i, j: (b, i, 0)),             # sin(q rows)
        pl.BlockSpec((1, tkv, D), lambda b, g, i, j: (b, j, 0)),            # cos(k rows)
        pl.BlockSpec((1, tkv, D), lambda b, g, i, j: (b, j, 0)),            # sin(k rows)
    ]
    inputs = [q, k, v, cos_pos, sin_pos, cos_pos, sin_pos]
    if has_mask:
        in_specs.append(
            pl.BlockSpec((1, 1, tq, tkv), lambda b, g, i, j: (b, 0, i, j)))
        inputs.append(attention_mask)

    nbytes = q.dtype.itemsize
    mask_bytes = (attention_mask.size * attention_mask.dtype.itemsize
                  if has_mask else 0)
    cost = pl.CostEstimate(
        flops=int(4 * B * NH * S * S * D),
        transcendentals=int(B * NH * S * S),
        bytes_accessed=int((2 * q.size + k.size + v.size) * nbytes
                           + 2 * (cos_pos.size + sin_pos.size)
                           * cos_pos.dtype.itemsize + mask_bytes))

    kernel = functools.partial(_flash_attn_kernel, scale=scale, groups=groups,
                               causal=causal, has_mask=has_mask)

    return pl.pallas_call(
        kernel,
        out_shape=jax.ShapeDtypeStruct((B, NH, S, D), q.dtype),
        grid_spec=pltpu.PrefetchScalarGridSpec(
            num_scalar_prefetch=0,
            grid=(B, KVH, n_q, n_kv),
            in_specs=in_specs,
            out_specs=pl.BlockSpec((1, groups, tq, D),
                                   lambda b, g, i, j: (b, g, i, 0)),
            scratch_shapes=[
                pltpu.VMEM((groups * tq, 1), jnp.float32),   # running max m
                pltpu.VMEM((groups * tq, 1), jnp.float32),   # running sum l
                pltpu.VMEM((groups * tq, D), jnp.float32),   # output accumulator
            ],
        ),
        compiler_params=pltpu.CompilerParams(
            dimension_semantics=("parallel", "parallel", "parallel",
                                 "arbitrary"),
            vmem_limit_bytes=_VMEM_LIMIT_BYTES),
        cost_estimate=cost,
    )(*inputs)


# ---------------------------------------------------------------------------
# Full module forward
# ---------------------------------------------------------------------------
def prepare_attention_weights(wq, wk, wv, wo):
    """One-time weight preparation (call at model init, NOT per forward):
    fuse q/k/v into a single (H, H + 2*Hkv) matrix so the QKV projection is a
    single MXU pass, and pre-transpose Wo."""
    return jnp.concatenate([wq, wk, wv], axis=0).T, wo.T


def attention_forward(hidden_states, w_qkv_t, wo_t, cos_cache, sin_cache,
                      position_ids, attention_mask=None, *, num_heads,
                      num_kv_heads, causal=False):
    B, S, H = hidden_states.shape
    D = H // num_heads
    Hkv = num_kv_heads * D

    x2 = hidden_states.reshape(B * S, H)
    qkv = _linear(x2, w_qkv_t)                       # (B*S, H + 2*Hkv)

    # Head split.  The transposes below are plain XLA ops; for the common
    # D % 128 == 0 case they could be folded into the attention BlockSpecs
    # (index_map over the packed qkv layout), but the explicit (B, NH, S, D)
    # layout keeps the kernel block shapes legal for any head_dim.
    q = qkv[:, :H].reshape(B, S, num_heads, D).transpose(0, 2, 1, 3)
    k = qkv[:, H:H + Hkv].reshape(B, S, num_kv_heads, D).transpose(0, 2, 1, 3)
    v = qkv[:, H + Hkv:].reshape(B, S, num_kv_heads, D).transpose(0, 2, 1, 3)

    cos_pos = cos_cache[position_ids].astype(hidden_states.dtype)   # (B, S, D)
    sin_pos = sin_cache[position_ids].astype(hidden_states.dtype)

    attn = _flash_attention(q, k, v, cos_pos, sin_pos, attention_mask,
                            causal=causal)           # (B, NH, S, D)

    attn_flat = attn.transpose(0, 2, 1, 3).reshape(B * S, H)
    out = _linear(attn_flat, wo_t)
    return out.reshape(B, S, H)


def build_rope_cache(dim, max_pos, base=10000.0, dtype=jnp.float32):
    inv_freq = 1.0 / (base ** (jnp.arange(0, dim, 2, dtype=jnp.float32) / dim))
    t = jnp.arange(max_pos, dtype=jnp.float32)
    freqs = jnp.einsum("i,j->ij", t, inv_freq)
    emb = jnp.concatenate([freqs, freqs], axis=-1)
    return jnp.cos(emb).astype(dtype), jnp.sin(emb).astype(dtype)


# ---------------------------------------------------------------------------
# Pure-JAX reference (mirrors the PyTorch forward)
# ---------------------------------------------------------------------------
def _reference(x, wq, wk, wv, wo, cos_cache, sin_cache, position_ids, mask,
               num_heads, num_kv_heads):
    B, S, H = x.shape
    D = H // num_heads
    groups = num_heads // num_kv_heads
    q = jnp.einsum("bsh,oh->bso", x, wq).reshape(B, S, num_heads, D).transpose(0, 2, 1, 3)
    k = jnp.einsum("bsh,oh->bso", x, wk).reshape(B, S, num_kv_heads, D).transpose(0, 2, 1, 3)
    v = jnp.einsum("bsh,oh->bso", x, wv).reshape(B, S, num_kv_heads, D).transpose(0, 2, 1, 3)
    cos = cos_cache[position_ids][:, None, :, :].astype(x.dtype)
    sin = sin_cache[position_ids][:, None, :, :].astype(x.dtype)

    def rot_half(t):
        t1, t2 = t[..., :D // 2], t[..., D // 2:]
        return jnp.concatenate([-t2, t1], axis=-1)

    q = q * cos + rot_half(q) * sin
    k = k * cos + rot_half(k) * sin
    k = jnp.repeat(k, groups, axis=1)
    v = jnp.repeat(v, groups, axis=1)
    s = jnp.einsum("bhqd,bhkd->bhqk", q, k) / math.sqrt(D)
    s = s + mask
    p = jax.nn.softmax(s.astype(jnp.float32), axis=-1).astype(x.dtype)
    o = jnp.einsum("bhqk,bhkd->bhqd", p, v)
    o = o.transpose(0, 2, 1, 3).reshape(B, S, H)
    return jnp.einsum("bsh,oh->bso", o, wo)


if __name__ == "__main__":
    B, S, H = 2, 8, 32
    num_heads, num_kv_heads = 4, 2
    D = H // num_heads
    max_pos = 64

    key = jax.random.PRNGKey(0)
    kx, kq, kk, kv, ko = jax.random.split(key, 5)
    x = jax.random.normal(kx, (B, S, H), dtype=jnp.float32)
    wq = 0.02 * jax.random.normal(kq, (H, H), dtype=jnp.float32)
    wk = 0.02 * jax.random.normal(kk, (num_kv_heads * D, H), dtype=jnp.float32)
    wv = 0.02 * jax.random.normal(kv, (num_kv_heads * D, H), dtype=jnp.float32)
    wo = 0.02 * jax.random.normal(ko, (H, H), dtype=jnp.float32)

    # One-time weight prep (hoisted out of the per-call path).
    w_qkv_t, wo_t = prepare_attention_weights(wq, wk, wv, wo)

    cos_cache, sin_cache = build_rope_cache(D, max_pos)
    position_ids = jnp.broadcast_to(jnp.arange(S, dtype=jnp.int32), (B, S))

    # Standard additive causal mask (what transformers would pass in).
    neg = jnp.finfo(jnp.float32).min
    causal_mask = jnp.where(
        jnp.arange(S)[:, None] >= jnp.arange(S)[None, :], 0.0, neg)
    mask = jnp.broadcast_to(causal_mask, (B, 1, S, S)).astype(jnp.float32)

    ref = _reference(x, wq, wk, wv, wo, cos_cache, sin_cache, position_ids,
                     mask, num_heads, num_kv_heads)

    # Path 1: causal mask generated inside the kernel (no O(S^2) mask DMA).
    out_causal = attention_forward(
        x, w_qkv_t, wo_t, cos_cache, sin_cache, position_ids, None,
        num_heads=num_heads, num_kv_heads=num_kv_heads, causal=True)
    out_causal = jax.block_until_ready(out_causal)

    # Path 2: explicit additive attention_mask, streamed tile-by-tile.
    out_masked = attention_forward(
        x, w_qkv_t, wo_t, cos_cache, sin_cache, position_ids, mask,
        num_heads=num_heads, num_kv_heads=num_kv_heads, causal=False)
    out_masked = jax.block_until_ready(out_masked)

    assert out_causal.shape == (B, S, H)
    assert jnp.allclose(out_causal, ref, atol=1e-4, rtol=1e-3), \
        "causal-path mismatch vs reference"
    assert jnp.allclose(out_masked, ref, atol=1e-4, rtol=1e-3), \
        "mask-path mismatch vs reference"

    print("KERNEL_OK")
</pallas_src>

<mosaic_0001>
module attributes {stable_mosaic.version = 11 : i64} {
  func.func @_matmul_kernel(%arg0: i32, %arg1: i32, %arg2: i32, %arg3: memref<16x32xf32, #tpu.memory_space<vmem>>, %arg4: memref<32x64xf32, #tpu.memory_space<vmem>>, %arg5: memref<16x64xf32, #tpu.memory_space<vmem>>, %arg6: memref<16x64xf32, #tpu.memory_space<vmem>>) attributes {dimension_semantics = [#tpu.dimension_semantics<parallel>, #tpu.dimension_semantics<parallel>, #tpu.dimension_semantics<arbitrary>], iteration_bounds = array<i64: 1, 1, 1>, scalar_prefetch = 0 : i64, scratch_operands = 1 : i64, tpu.core_type = #tpu.core_type<tc>, window_params = [{transform_indices = @transform_0, window_bounds = array<i64: 16, 32>}, {transform_indices = @transform_1, window_bounds = array<i64: 32, 64>}, {transform_indices = @transform_2, window_bounds = array<i64: 16, 64>}]} {
    %c0_i32 = arith.constant 0 : i32
    %0 = arith.cmpi eq, %arg2, %c0_i32 : i32
    %1 = arith.extui %0 : i1 to i32
    %c0_i32_0 = arith.constant 0 : i32
    %2 = arith.cmpi ne, %1, %c0_i32_0 : i32
    scf.if %2 {
      %cst_10 = arith.constant 0.000000e+00 : f32
      %12 = vector.broadcast %cst_10 : f32 to vector<16x64xf32>
      %c0_11 = arith.constant 0 : index
      %c0_12 = arith.constant 0 : index
      %13 = vector.load %arg6[%c0_11, %c0_12] : memref<16x64xf32, #tpu.memory_space<vmem>>, vector<16x64xf32>
      tpu.vector_store %arg6[%c0_11, %c0_12], %12 {strides = array<i32>} : memref<16x64xf32, #tpu.memory_space<vmem>>, vector<16x64xf32>,
    } else {
    }
    %c0 = arith.constant 0 : index
    %c0_1 = arith.constant 0 : index
    %3 = vector.load %arg6[%c0, %c0_1] : memref<16x64xf32, #tpu.memory_space<vmem>>, vector<16x64xf32>
    %c0_2 = arith.constant 0 : index
    %c0_3 = arith.constant 0 : index
    %4 = vector.load %arg3[%c0_2, %c0_3] : memref<16x32xf32, #tpu.memory_space<vmem>>, vector<16x32xf32>
    %c0_4 = arith.constant 0 : index
    %c0_5 = arith.constant 0 : index
    %5 = vector.load %arg4[%c0_4, %c0_5] : memref<32x64xf32, #tpu.memory_space<vmem>>, vector<32x64xf32>
    %cst = arith.constant dense<0.000000e+00> : vector<16x64xf32>
    %6 = tpu.matmul %4, %5, %cst {dimension_numbers = #tpu.dot_dimension_numbers<[1], [0], [0], [1], [0, 0, 1, 1], [], []>} : vector<16x32xf32>, vector<32x64xf32>, vector<16x64xf32> -> vector<16x64xf32>
    %7 = arith.addf %3, %6 : vector<16x64xf32>
    %c0_6 = arith.constant 0 : index
    %c0_7 = arith.constant 0 : index
    %8 = vector.load %arg6[%c0_6, %c0_7] : memref<16x64xf32, #tpu.memory_space<vmem>>, vector<16x64xf32>
    tpu.vector_store %arg6[%c0_6, %c0_7], %7 {strides = array<i32>} : memref<16x64xf32, #tpu.memory_space<vmem>>, vector<16x64xf32>,
    %c0_i32_8 = arith.constant 0 : i32
    %9 = arith.cmpi eq, %arg2, %c0_i32_8 : i32
    %10 = arith.extui %9 : i1 to i32
    %c0_i32_9 = arith.constant 0 : i32
    %11 = arith.cmpi ne, %10, %c0_i32_9 : i32
    scf.if %11 {
      %c0_10 = arith.constant 0 : index
      %c0_11 = arith.constant 0 : index
      %12 = vector.load %arg6[%c0_10, %c0_11] : memref<16x64xf32, #tpu.memory_space<vmem>>, vector<16x64xf32>
      %c0_12 = arith.constant 0 : index
      %c0_13 = arith.constant 0 : index
      %13 = vector.load %arg5[%c0_12, %c0_13] : memref<16x64xf32, #tpu.memory_space<vmem>>, vector<16x64xf32>
      tpu.vector_store %arg5[%c0_12, %c0_13], %12 {strides = array<i32>} : memref<16x64xf32, #tpu.memory_space<vmem>>, vector<16x64xf32>,
    } else {
    }
    return
  }
  func.func @transform_0(%arg0: i32, %arg1: i32, %arg2: i32) -> (i32, i32) {
    %c0_i32 = arith.constant 0 : i32
    return %arg0, %arg2 : i32, i32
  }
  func.func @transform_1(%arg0: i32, %arg1: i32, %arg2: i32) -> (i32, i32) {
    %c0_i32 = arith.constant 0 : i32
    return %arg2, %arg1 : i32, i32
  }
  func.func @transform_2(%arg0: i32, %arg1: i32, %arg2: i32) -> (i32, i32) {
    %c0_i32 = arith.constant 0 : i32
    return %arg0, %arg1 : i32, i32
  }
}

</mosaic_0001>

<bundles_post_ra>
// kernel: tpu_custom_call.1
= control target key start
LH: loop header
LB: loop body
LE: loop exit
PB: predicated region body
PF: predicated region fallthrough
CT: control target
= control target key end

     0   :  { %7 = vsyncpa [#allocation4], 0  ;;  %s344_s0 = inlined_call_operand.hbm [shape: f32[16,32], index: 0, kind: input, shape index: {}]   ;;  %s345_s1 = inlined_call_operand.hbm [shape: f32[32,64], index: 1, kind: input, shape index: {}]   ;;  %s346_s2 = inlined_call_operand.hbm [shape: f32[16,64], index: 2, kind: output, shape index: {}]  }
   0x1   :  { %8 = vsyncpa [#allocation7], 0 }
   0x2   :  { %9 = vsyncpa [#allocation5], 0  ;;  %s272_s9 = smov [#allocation3]   ;;  %s200_s13 = scalar_lea.hbm %s344_s0, 256 }
   0x3   :  { %s15_s10 = sshll.u32 %s272_s9, 4  ;;  %p201_p0 = scmp.ne.s32.totalorder %s344_s0, %s200_s13  ;;  %s16_s10 = int_to_ptr.vmem [resolvable:$true] %s15_s10 }
   0x4   :  { %p204_p1 = scmp.lt.u32.totalorder %s200_s13, %s344_s0 }
   0x6   :  { %p206_p2 = pnand %p204_p1, %p201_p0 }
   0x8   :  { %209 = shalt.err (!%p206_p2)
}
   0x9   :  { %s210_s18 = scalar_lea.vmem %s16_s10, 256  ;;  %p215_p4 = scmp.lt.s32.totalorder %s16_s10, %s16_s10 }
   0xa   :  { %p211_p3 = scmp.ne.s32.totalorder %s16_s10, %s210_s18  ;;  %p216_p5 = scmp.lt.s32.totalorder %s210_s18, %s210_s18 }
   0xc   :  { %p217_p6 = por %p216_p5, %p215_p4 }
   0xe   :  { %p218_p7 = pnand %p217_p6, %p211_p3 }
  0x10   :  { %221 = shalt.err (!%p218_p7)
}
  0x11   :  { %s273_s19 = smov 128   ;;  %s274_s20 = smov 8  }
  0x12   :  { %21 = dma.hbm_to_vmem [thread:$0]  %s344_s0, 256, %s16_s10, [#allocation4], %s273_s19, %s273_s19, %s274_s20  }
  0x13   :  { %s275_s23 = smov [#allocation6]   ;;  %s222_s27 = scalar_lea.hbm %s345_s1, 512 }
  0x14   :  { %s27_s24 = sshll.u32 %s275_s23, 4  ;;  %p223_p8 = scmp.ne.s32.totalorder %s345_s1, %s222_s27  ;;  %s28_s24 = int_to_ptr.vmem [resolvable:$true] %s27_s24 }
  0x15   :  { %p226_p9 = scmp.lt.u32.totalorder %s222_s27, %s345_s1 }
  0x17   :  { %p228_p10 = pnand %p226_p9, %p223_p8 }
  0x19   :  { %231 = shalt.err (!%p228_p10)
}
  0x1a   :  { %s232_s4 = scalar_lea.vmem %s28_s24, 512  ;;  %p237_p12 = scmp.lt.s32.totalorder %s28_s24, %s28_s24 }
  0x1b   :  { %p233_p11 = scmp.ne.s32.totalorder %s28_s24, %s232_s4  ;;  %p238_p13 = scmp.lt.s32.totalorder %s232_s4, %s232_s4 }
  0x1d   :  { %p239_p0 = por %p238_p13, %p237_p12 }
  0x1f   :  { %p240_p1 = pnand %p239_p0, %p233_p11 }
  0x21   :  { %243 = shalt.err (!%p240_p1)
}
  0x22   :  { %33 = dma.hbm_to_vmem [thread:$0]  %s345_s1, 512, %s28_s24, [#allocation7], %s273_s19, %s273_s19, %s274_s20  }
  0x23   :  { %266 = dma.done.wait [#allocation4], 256  }
  0x24   :  { %267 = vsyncadd [#allocation4], 4294967040 }
  0x25   :  { %268 = dma.done.wait [#allocation7], 512  }
  0x26   :  { %269 = vsyncadd [#allocation7], 4294966784  ;;  %vm44_vm0 = vcmask 523264   ;;  %v276_v0 = vmov 0.0   ;;  %vm55_vm1 = vcmask 261120   ;;  %v51_v1 = vld [vmem:[#allocation6] sm:$0xff] }
  0x27   :  { %46 = vst.msk [vmem:[#allocation2 + $0x8] sm:$0xff] %vm44_vm0, %v276_v0  ;;  %45 = vst.msk [vmem:[#allocation2] sm:$0xff] %vm44_vm0, %v276_v0  ;;  %v52_v2 = vld [vmem:[#allocation6 + $0x8] sm:$0xff]  ;;  %v53_v3 = vld [vmem:[#allocation6 + $0x10] sm:$0xff]  ;;  %s277_s1 = smov [#allocation8]  }
  0x28   :  { %v186_v4 = vpack.c.bf16 %v52_v2, %v51_v1  ;;  %v54_v5 = vld [vmem:[#allocation6 + $0x18] sm:$0xff]  ;;  %v49_v6 = vld [vmem:[#allocation3] sm:$0xff]  ;;  %s154_s6 = sshll.u32 %s277_s1, 4  ;;  %s155_s6 = int_to_ptr.vmem [resolvable:$true] %s154_s6 }
  0x29   :  { %v190_v7 = vpack.c.bf16 %v54_v5, %v53_v3  ;;  %183 = vmatprep.mubr.msk.f32.mxu0 %vm55_vm1, %v49_v6  ;;  %v50_v8 = vld [vmem:[#allocation3 + $0x8] sm:$0xff]  ;;  %s244_s7 = scalar_lea.vmem %s155_s6, 256  ;;  %p249_p3 = scmp.lt.s32.totalorder %s155_s6, %s155_s6 }
  0x2a   :  { %187 = vmatprep.subr.bf16.mxu0 %v186_v4  ;;  %p245_p2 = scmp.ne.s32.totalorder %s155_s6, %s244_s7  ;;  %p250_p4 = scmp.lt.s32.totalorder %s244_s7, %s244_s7 }
  0x2b   :  { %189 = vmatpush3.bf16.msra.mxu0 %v186_v4 }
  0x2c   :  { %191 = vmatprep.subr.bf16.mxu0 %v190_v7  ;;  %p251_p5 = por %p250_p4, %p249_p3 }
  0x2e   :  { %v48_v9 = vld [vmem:[#allocation2 + $0x8] sm:$0xff]  ;;  %v47_v10 = vld [vmem:[#allocation2] sm:$0xff]  ;;  %p252_p6 = pnand %p251_p5, %p245_p2 }
  0x2f   :  { %193 = vmatpush3.bf16.msra.mxu0 %v190_v7 }
  0x32   :  { %184 = vmatmul.mubr.msk.f32.vlgmr.msra.gmra.mrb[0].mxu0 %vm55_vm1, %v50_v8 }
 0x105   :  { %v185_v11 = vpop.f32.mrb[0].mxu0 }
 0x106   :  { %v138_v12 = vadd.f32 %v185_v11, %v48_v9  ;;  %v128_v13 = vpop.f32.mrb[1].mxu0 }
 0x107   :  { %v137_v14 = vadd.f32 %v128_v13, %v47_v10 }
 0x108   :  { %141 = vst.msk [vmem:[#allocation2 + $0x8] sm:$0xff] %vm44_vm0, %v138_v12 }
 0x109   :  { %140 = vst.msk [vmem:[#allocation2] sm:$0xff] %vm44_vm0, %v137_v14 }
 0x10f   :  { %v146_v15 = vld [vmem:[#allocation2 + $0x8] sm:$0xff] }
 0x110   :  { %v145_v16 = vld [vmem:[#allocation2] sm:$0xff]  ;;  %148 = vst.msk [vmem:[#allocation8 + $0x8] sm:$0xff] %vm44_vm0, %v146_v15 }
 0x111   :  { %147 = vst.msk [vmem:[#allocation8] sm:$0xff] %vm44_vm0, %v145_v16 }
 0x112   :  { %255 = shalt.err (!%p252_p6)
}
 0x113   :  { %s256_s10 = scalar_lea.hbm %s346_s2, 256 }
 0x114   :  { %p257_p7 = scmp.ne.s32.totalorder %s346_s2, %s256_s10  ;;  %p260_p8 = scmp.lt.u32.totalorder %s256_s10, %s346_s2 }
 0x116   :  { %p262_p9 = pnand %p260_p8, %p257_p7 }
 0x118   :  { %265 = shalt.err (!%p262_p9)
}
 0x119   :  { %160 = dma.vmem_to_hbm [thread:$0]  %s155_s6, 256, %s346_s2, [#allocation5], %s273_s19, %s273_s19, %s274_s20  }
 0x11a   :  { %270 = dma.done.wait [#allocation5], 256  }
 0x11b   :  { %271 = vsyncadd [#allocation5], 4294967040 }
 0x11c   :  { %164 = vsyncpa [#allocation4], 1 }
 0x11d   :  { %165 = vsyncpa [#allocation7], 1 }
 0x11e   :  { %166 = vsyncpa [#allocation5], 1 }

</bundles_post_ra>
